<compile_context>
chip_gen: v7x
topology: tpu7x:2x2x1
jax: 0.10.0
libtpu: 0.0.40
codegen_flags: <defaults>
</compile_context>

<pallas_src>
import functools

import jax
import jax.numpy as jnp
from jax.experimental import pallas as pl
from jax.experimental.pallas import tpu as pltpu


_VMEM_LIMIT_BYTES = 32 * 1024 * 1024   # safe across v5e / v6e / v7x
_TARGET_TILE_BYTES = 4 << 20           # ~4 MiB of output per grid step
_SPLIT_THRESHOLD_BYTES = 2 << 20       # force >=2 grid steps above this (v7x: 2 TCs)
_SMALL_FAST_PATH_BYTES = 256 << 10     # below this, let XLA fuse plain jnp
_PER_BATCH_N_TILE_BYTES = 1 << 20      # 3-D: tile along N (not B) above this


def _matcher_kernel(ori_ref, cand_ref, out_ref, *, d, pack_row):
    # ori_ref:  (1, d), (rows, d) or (tile_b, 1, d)   original encoding (broadcast)
    # cand_ref: (rows, d) or (tile_b, n, d)           candidate encodings
    # out_ref:  (rows, 4*d) or (tile_b, n, 4*d)
    cand = cand_ref[...]
    ori = jnp.broadcast_to(ori_ref[...], cand.shape)  # no-op when shapes match

    if pack_row:
        # D not lane-aligned: masked quarter stores would be 4x vst.msk per
        # output vreg. Assemble the full row in-vreg (XLU is a free slot here)
        # and issue full-lane stores. torch order: [diff, prod, ori, cand].
        out_ref[...] = jnp.concatenate(
            [ori - cand, ori * cand, ori, cand], axis=-1)
    elif len(out_ref.shape) == 2:
        # D is a multiple of 128: quarter slices are lane-aligned, stores are
        # already unmasked and avoid any cross-lane shuffle.
        out_ref[:, 0:d] = ori - cand
        out_ref[:, d:2 * d] = ori * cand
        out_ref[:, 2 * d:3 * d] = ori
        out_ref[:, 3 * d:4 * d] = cand
    else:
        out_ref[:, :, 0:d] = ori - cand
        out_ref[:, :, d:2 * d] = ori * cand
        out_ref[:, :, 2 * d:3 * d] = ori
        out_ref[:, :, 3 * d:4 * d] = cand


def _pick_row_tile(total_rows, bytes_per_row, dtype, *,
                   sublane_align=True, ensure_split=True):
    """Pick a row tile carrying ~_TARGET_TILE_BYTES of output per grid step.

    sublane_align: the row axis is the second-to-last block dim, so the tile
        must be a multiple of the sublane packing (unless full-extent).
    ensure_split:  when the total output is big enough, cap the tile so the
        grid has >= 2 steps (v7x has 2 TensorCores; a 1-step "parallel" grid
        leaves one idle).
    """
    itemsize = jnp.dtype(dtype).itemsize
    sub = ({1: 32, 2: 16}.get(itemsize, 8)) if sublane_align else 1
    bytes_per_row = max(int(bytes_per_row), 1)

    t = max(sub, (_TARGET_TILE_BYTES // bytes_per_row) // sub * sub)

    total_bytes = total_rows * bytes_per_row
    if ensure_split and total_bytes > _SPLIT_THRESHOLD_BYTES and total_rows >= 2 * sub:
        t = min(t, max(sub, (total_rows // 2) // sub * sub))

    if total_rows <= t:
        return total_rows  # full-extent block (allowed even if not a sublane multiple)
    return t


def _jnp_fallback(ori, cand):
    """Fused XLA path for tiny inputs (pallas_call fixed cost would dominate)."""
    if cand.ndim == 3:
        ori = jnp.broadcast_to(ori[:, None, :], cand.shape)
    return jnp.concatenate([ori - cand, ori * cand, ori, cand], axis=-1)


def concatenate_matcher(ori_plan_encoding, candidate_plan_encodings, *,
                        force_pallas=False):
    """JAX/Pallas equivalent of ConcatenateMatcher.forward."""
    # Note: jnp.result_type promotion may differ from torch's rules for mixed
    # int/float inputs; the intended use is floating-point encodings.
    out_dtype = jnp.result_type(ori_plan_encoding.dtype,
                                candidate_plan_encodings.dtype)
    ori = ori_plan_encoding.astype(out_dtype)
    cand = candidate_plan_encodings.astype(out_dtype)

    D = ori.shape[-1]
    itemsize = jnp.dtype(out_dtype).itemsize
    pack_row = (D % 128) != 0
    kernel = functools.partial(_matcher_kernel, d=D, pack_row=pack_row)

    # ------------------------------------------------------------------ 2-D
    if cand.ndim == 2:
        B, Dc = cand.shape
        assert Dc == D and ori.shape == (B, D)
        out_bytes = B * 4 * D * itemsize
        if not force_pallas and out_bytes < _SMALL_FAST_PATH_BYTES:
            return _jnp_fallback(ori, cand)

        tile_b = _pick_row_tile(B, 4 * D * itemsize, out_dtype,
                                sublane_align=True, ensure_split=True)
        grid = (pl.cdiv(B, tile_b),)
        return pl.pallas_call(
            kernel,
            out_shape=jax.ShapeDtypeStruct((B, 4 * D), out_dtype),
            grid_spec=pltpu.PrefetchScalarGridSpec(
                num_scalar_prefetch=0,
                grid=grid,
                in_specs=[
                    pl.BlockSpec((tile_b, D), lambda i: (i, 0)),
                    pl.BlockSpec((tile_b, D), lambda i: (i, 0)),
                ],
                out_specs=pl.BlockSpec((tile_b, 4 * D), lambda i: (i, 0)),
            ),
            compiler_params=pltpu.CompilerParams(
                dimension_semantics=("parallel",),
                vmem_limit_bytes=_VMEM_LIMIT_BYTES),
        )(ori, cand)

    # ------------------------------------------------------------------ 3-D
    B, N, Dc = cand.shape
    assert Dc == D and ori.shape == (B, D)
    out_bytes = B * N * 4 * D * itemsize
    if not force_pallas and out_bytes < _SMALL_FAST_PATH_BYTES:
        return _jnp_fallback(ori, cand)

    ori3 = ori[:, None, :]  # (B, 1, D) -- glue reshape, broadcast in-kernel
    per_batch_out_bytes = N * 4 * D * itemsize

    if per_batch_out_bytes >= _PER_BATCH_N_TILE_BYTES:
        # Strategy A: enough work per batch -> tile along N inside each batch.
        # N stays the inner grid axis so the (1, D) ori block is not re-DMA'd.
        tile_n = _pick_row_tile(N, 4 * D * itemsize, out_dtype,
                                sublane_align=True, ensure_split=(B < 2))
        grid = (B, pl.cdiv(N, tile_n))
        return pl.pallas_call(
            kernel,
            out_shape=jax.ShapeDtypeStruct((B, N, 4 * D), out_dtype),
            grid_spec=pltpu.PrefetchScalarGridSpec(
                num_scalar_prefetch=0,
                grid=grid,
                in_specs=[
                    # leading size-1 batch dim squeezed out of the kernel view
                    pl.BlockSpec((None, 1, D), lambda b, n: (b, 0, 0)),
                    pl.BlockSpec((None, tile_n, D), lambda b, n: (b, n, 0)),
                ],
                out_specs=pl.BlockSpec((None, tile_n, 4 * D),
                                       lambda b, n: (b, n, 0)),
            ),
            compiler_params=pltpu.CompilerParams(
                dimension_semantics=("parallel", "parallel"),
                vmem_limit_bytes=_VMEM_LIMIT_BYTES),
        )(ori3, cand)

    # Strategy B: per-batch work is small -> pack several batches per grid
    # step so each step still carries ~_TARGET_TILE_BYTES. The batch axis is
    # not one of the last-two block dims, so no sublane alignment is needed.
    tile_b = _pick_row_tile(B, per_batch_out_bytes, out_dtype,
                            sublane_align=False, ensure_split=True)
    grid = (pl.cdiv(B, tile_b),)
    return pl.pallas_call(
        kernel,
        out_shape=jax.ShapeDtypeStruct((B, N, 4 * D), out_dtype),
        grid_spec=pltpu.PrefetchScalarGridSpec(
            num_scalar_prefetch=0,
            grid=grid,
            in_specs=[
                pl.BlockSpec((tile_b, 1, D), lambda i: (i, 0, 0)),
                pl.BlockSpec((tile_b, N, D), lambda i: (i, 0, 0)),
            ],
            out_specs=pl.BlockSpec((tile_b, N, 4 * D), lambda i: (i, 0, 0)),
        ),
        compiler_params=pltpu.CompilerParams(
            dimension_semantics=("parallel",),
            vmem_limit_bytes=_VMEM_LIMIT_BYTES),
    )(ori3, cand)


def _reference(ori, cand):
    """Pure-JAX reference mirroring the PyTorch forward exactly."""
    expanded_ori = ori[:, None, :]
    if cand.ndim == 2:
        expanded_cand = cand[:, None, :]
        expanded_plan = expanded_ori
    else:
        expanded_cand = cand
        expanded_plan = jnp.repeat(expanded_ori, cand.shape[1], axis=1)
    concatenated = jnp.concatenate([expanded_plan, expanded_cand], axis=2)
    concatenated = jnp.concatenate(
        [expanded_plan - expanded_cand,
         expanded_plan * expanded_cand,
         concatenated], axis=2)
    if cand.ndim == 2:
        concatenated = concatenated[:, 0, :]
    return concatenated


if __name__ == "__main__":
    key = jax.random.PRNGKey(0)
    k1, k2, k3, k4, k5, k6 = jax.random.split(key, 6)

    # -------- T1: 3-D candidates, small D (pack_row path, batch-packed tiles)
    B, N, D = 2, 8, 32  # encoding_dim = 32 -> output dim = 128
    ori = jax.random.normal(k1, (B, D), dtype=jnp.float32)
    cand3 = jax.random.normal(k2, (B, N, D), dtype=jnp.float32)
    out3 = concatenate_matcher(ori, cand3, force_pallas=True)
    jax.block_until_ready(out3)
    ref3 = _reference(ori, cand3)
    assert out3.shape == (B, N, 4 * D)
    assert jnp.allclose(out3, ref3, atol=1e-6)

    # -------- T2: 2-D candidates, small D (pack_row path)
    cand2 = jax.random.normal(k3, (B, D), dtype=jnp.float32)
    out2 = concatenate_matcher(ori, cand2, force_pallas=True)
    jax.block_until_ready(out2)
    ref2 = _reference(ori, cand2)
    assert out2.shape == (B, 4 * D)
    assert jnp.allclose(out2, ref2, atol=1e-6)

    # -------- T3: 3-D candidates, lane-aligned D, tile-along-N strategy
    B3, N3, D3 = 2, 512, 128
    ori_a = jax.random.normal(k4, (B3, D3), dtype=jnp.float32)
    cand_a = jax.random.normal(k5, (B3, N3, D3), dtype=jnp.float32)
    out_a = concatenate_matcher(ori_a, cand_a, force_pallas=True)
    jax.block_until_ready(out_a)
    ref_a = _reference(ori_a, cand_a)
    assert out_a.shape == (B3, N3, 4 * D3)
    assert jnp.allclose(out_a, ref_a, atol=1e-6)

    # -------- T4: tiny-input fast path (skips Pallas, fused jnp)
    cand_small = jax.random.normal(k6, (B, N, D), dtype=jnp.float32)
    out_fp = concatenate_matcher(ori, cand_small)
    jax.block_until_ready(out_fp)
    assert jnp.allclose(out_fp, _reference(ori, cand_small), atol=1e-6)

    print("KERNEL_OK")
</pallas_src>

<mosaic_0001>
module attributes {stable_mosaic.version = 11 : i64} {
  func.func @_matcher_kernel(%arg0: i32, %arg1: memref<2x1x32xf32, #tpu.memory_space<vmem>>, %arg2: memref<2x8x32xf32, #tpu.memory_space<vmem>>, %arg3: memref<2x8x128xf32, #tpu.memory_space<vmem>>) attributes {dimension_semantics = [#tpu.dimension_semantics<parallel>], iteration_bounds = array<i64: 1>, scalar_prefetch = 0 : i64, scratch_operands = 0 : i64, tpu.core_type = #tpu.core_type<tc>, window_params = [{transform_indices = @transform_0, window_bounds = array<i64: 2, 1, 32>}, {transform_indices = @transform_1, window_bounds = array<i64: 2, 8, 32>}, {transform_indices = @transform_2, window_bounds = array<i64: 2, 8, 128>}]} {
    %c0 = arith.constant 0 : index
    %c0_0 = arith.constant 0 : index
    %c0_1 = arith.constant 0 : index
    %0 = vector.load %arg2[%c0, %c0_0, %c0_1] : memref<2x8x32xf32, #tpu.memory_space<vmem>>, vector<2x8x32xf32>
    %c0_2 = arith.constant 0 : index
    %c0_3 = arith.constant 0 : index
    %c0_4 = arith.constant 0 : index
    %1 = vector.load %arg1[%c0_2, %c0_3, %c0_4] : memref<2x1x32xf32, #tpu.memory_space<vmem>>, vector<2x1x32xf32>
    %2 = vector.shape_cast %1 : vector<2x1x32xf32> to vector<2x1x32xf32>
    %3 = vector.broadcast %2 : vector<2x1x32xf32> to vector<2x8x32xf32>
    %4 = arith.subf %3, %0 : vector<2x8x32xf32>
    %5 = arith.mulf %3, %0 : vector<2x8x32xf32>
    %6 = tpu.concatenate %4, %5, %3, %0 in 2 : vector<2x8x32xf32>, vector<2x8x32xf32>, vector<2x8x32xf32>, vector<2x8x32xf32> -> vector<2x8x128xf32>
    %c0_5 = arith.constant 0 : index
    %c0_6 = arith.constant 0 : index
    %c0_7 = arith.constant 0 : index
    %7 = vector.load %arg3[%c0_5, %c0_6, %c0_7] : memref<2x8x128xf32, #tpu.memory_space<vmem>>, vector<2x8x128xf32>
    tpu.vector_store %arg3[%c0_5, %c0_6, %c0_7], %6 {strides = array<i32>} : memref<2x8x128xf32, #tpu.memory_space<vmem>>, vector<2x8x128xf32>,
    return
  }
  func.func @transform_0(%arg0: i32) -> (i32, i32, i32) {
    %c0_i32 = arith.constant 0 : i32
    %c0_i32_0 = arith.constant 0 : i32
    %c0_i32_1 = arith.constant 0 : i32
    return %arg0, %c0_i32, %c0_i32_0 : i32, i32, i32
  }
  func.func @transform_1(%arg0: i32) -> (i32, i32, i32) {
    %c0_i32 = arith.constant 0 : i32
    %c0_i32_0 = arith.constant 0 : i32
    %c0_i32_1 = arith.constant 0 : i32
    return %arg0, %c0_i32, %c0_i32_0 : i32, i32, i32
  }
  func.func @transform_2(%arg0: i32) -> (i32, i32, i32) {
    %c0_i32 = arith.constant 0 : i32
    %c0_i32_0 = arith.constant 0 : i32
    %c0_i32_1 = arith.constant 0 : i32
    return %arg0, %c0_i32, %c0_i32_0 : i32, i32, i32
  }
}

</mosaic_0001>

<bundles_post_ra>
// kernel: tpu_custom_call.1
= control target key start
LH: loop header
LB: loop body
LE: loop exit
PB: predicated region body
PF: predicated region fallthrough
CT: control target
= control target key end

     0   :  { %7 = vsyncpa [#allocation3], 0  ;;  %s262_s0 = inlined_call_operand.hbm [shape: f32[2,1,32], index: 0, kind: input, shape index: {}]   ;;  %s263_s1 = inlined_call_operand.hbm [shape: f32[2,8,32], index: 1, kind: input, shape index: {}]   ;;  %s264_s2 = inlined_call_operand.hbm [shape: f32[2,8,128], index: 2, kind: output, shape index: {}]  }
   0x1   :  { %8 = vsyncpa [#allocation6], 0 }
   0x2   :  { %9 = vsyncpa [#allocation4], 0  ;;  %s195_s9 = smov [#allocation2]   ;;  %s123_s13 = scalar_lea.hbm %s262_s0, 32 }
   0x3   :  { %s15_s10 = sshll.u32 %s195_s9, 4  ;;  %p124_p0 = scmp.ne.s32.totalorder %s262_s0, %s123_s13  ;;  %s16_s10 = int_to_ptr.vmem [resolvable:$true] %s15_s10 }
   0x4   :  { %p127_p1 = scmp.lt.u32.totalorder %s123_s13, %s262_s0 }
   0x6   :  { %p129_p2 = pnand %p127_p1, %p124_p0 }
   0x8   :  { %132 = shalt.err (!%p129_p2)
}
   0x9   :  { %s133_s18 = scalar_lea.vmem %s16_s10, 32  ;;  %p138_p4 = scmp.lt.s32.totalorder %s16_s10, %s16_s10 }
   0xa   :  { %p134_p3 = scmp.ne.s32.totalorder %s16_s10, %s133_s18  ;;  %p139_p5 = scmp.lt.s32.totalorder %s133_s18, %s133_s18 }
   0xc   :  { %p140_p6 = por %p139_p5, %p138_p4 }
   0xe   :  { %p141_p7 = pnand %p140_p6, %p134_p3 }
  0x10   :  { %144 = shalt.err (!%p141_p7)
}
  0x11   :  { %s196_s19 = smov 16   ;;  %s197_s20 = smov 1  }
  0x12   :  { %21 = dma.hbm_to_vmem [thread:$0]  %s262_s0, 32, %s16_s10, [#allocation3], %s196_s19, %s196_s19, %s197_s20  }
  0x13   :  { %s198_s23 = smov [#allocation5]   ;;  %s145_s27 = scalar_lea.hbm %s263_s1, 256 }
  0x14   :  { %s27_s24 = sshll.u32 %s198_s23, 4  ;;  %p146_p8 = scmp.ne.s32.totalorder %s263_s1, %s145_s27  ;;  %s28_s24 = int_to_ptr.vmem [resolvable:$true] %s27_s24 }
  0x15   :  { %p149_p9 = scmp.lt.u32.totalorder %s145_s27, %s263_s1 }
  0x17   :  { %p151_p10 = pnand %p149_p9, %p146_p8 }
  0x19   :  { %154 = shalt.err (!%p151_p10)
}
  0x1a   :  { %s155_s4 = scalar_lea.vmem %s28_s24, 256  ;;  %p160_p12 = scmp.lt.s32.totalorder %s28_s24, %s28_s24 }
  0x1b   :  { %p156_p11 = scmp.ne.s32.totalorder %s28_s24, %s155_s4  ;;  %p161_p13 = scmp.lt.s32.totalorder %s155_s4, %s155_s4 }
  0x1d   :  { %p162_p0 = por %p161_p13, %p160_p12 }
  0x1f   :  { %p163_p1 = pnand %p162_p0, %p156_p11 }
  0x21   :  { %166 = shalt.err (!%p163_p1)
}
  0x22   :  { %s199_s0 = smov 128   ;;  %s200_s5 = smov 8  }
  0x23   :  { %33 = dma.hbm_to_vmem [thread:$0]  %s263_s1, 256, %s28_s24, [#allocation6], %s199_s0, %s199_s0, %s200_s5  }
  0x24   :  { %189 = dma.done.wait [#allocation3], 32  }
  0x25   :  { %190 = vsyncadd [#allocation3], 4294967264 }
  0x26   :  { %191 = dma.done.wait [#allocation6], 256  }
  0x27   :  { %192 = vsyncadd [#allocation6], 4294967040  ;;  %v111_v0 = vld [vmem:[#allocation2] ss:$0 sm:$0xff]  ;;  %v40_v1 = vld [vmem:[#allocation5] sm:$0xff]  ;;  %s201_s8 = smov 64  }
  0x28   :  { %v112_v2 = vld [vmem:[#allocation2 + $0x1] ss:$0 sm:$0xff]  ;;  %68 = vrot.lane.b32.xlu1 %v111_v0, %s201_s8  ;;  %v58_v3 = vmul.f32 %v111_v0, %v40_v1  ;;  %v56_v4 = vsub.f32 %v111_v0, %v40_v1  ;;  %v41_v5 = vld [vmem:[#allocation5 + $0x8] sm:$0xff]  ;;  %s202_s9 = smov 32   ;;  %s203_s10 = smov 96   ;;  %vm82_vm0 = vcmask 261120  }
  0x29   :  { %v57_v6 = vsub.f32 %v112_v2, %v41_v5  ;;  %v59_v7 = vmul.f32 %v112_v2, %v41_v5  ;;  %vm88_vm1 = vcmask 785408   ;;  %vm85_vm2 = vcmask 523264   ;;  %s204_s1 = smov [#allocation7]  }
  0x2a   :  { %62 = vrot.lane.b32.xlu0 %v58_v3, %s202_s9  ;;  %s98_s11 = sshll.u32 %s204_s1, 4  ;;  %s99_s11 = int_to_ptr.vmem [resolvable:$true] %s98_s11 }
  0x2b   :  { %s167_s12 = scalar_lea.vmem %s99_s11, 256  ;;  %p172_p3 = scmp.lt.s32.totalorder %s99_s11, %s99_s11 }
  0x2c   :  { %70 = vrot.lane.b32.xlu1 %v112_v2, %s201_s8  ;;  %p168_p2 = scmp.ne.s32.totalorder %s99_s11, %s167_s12  ;;  %p173_p4 = scmp.lt.s32.totalorder %s167_s12, %s167_s12 }
  0x2e   :  { %64 = vrot.lane.b32.xlu0 %v59_v7, %s202_s9  ;;  %p174_p5 = por %p173_p4, %p172_p3 }
  0x30   :  { %78 = vrot.lane.b32.xlu1 %v41_v5, %s203_s10  ;;  %p175_p6 = pnand %p174_p5, %p168_p2 }
  0x32   :  { %76 = vrot.lane.b32.xlu0 %v40_v1, %s203_s10 }
  0x9a   :  { %v69_v8 = vpop.permute.xlu1 %68 }
  0x9c   :  { %v63_v9 = vpop.permute.xlu0 %62 }
  0x9d   :  { %v83_v12 = vsel %vm82_vm0, %v56_v4, %v63_v9 }
  0x9e   :  { %v71_v10 = vpop.permute.xlu1 %70  ;;  %v86_v18 = vsel %vm85_vm2, %v83_v12, %v69_v8 }
  0xa0   :  { %v65_v11 = vpop.permute.xlu0 %64 }
  0xa1   :  { %v84_v13 = vsel %vm82_vm0, %v57_v6, %v65_v11 }
  0xa2   :  { %v79_v14 = vpop.permute.xlu1 %78  ;;  %v87_v15 = vsel %vm85_vm2, %v84_v13, %v71_v10 }
  0xa3   :  { %v90_v16 = vsel %vm88_vm1, %v87_v15, %v79_v14 }
  0xa4   :  { %92 = vst [vmem:[#allocation7 + $0x8] sm:$0xff] %v90_v16  ;;  %v77_v17 = vpop.permute.xlu0 %76 }
  0xa5   :  { %v89_v19 = vsel %vm88_vm1, %v86_v18, %v77_v17 }
  0xa6   :  { %91 = vst [vmem:[#allocation7] sm:$0xff] %v89_v19 }
  0xa7   :  { %178 = shalt.err (!%p175_p6)
}
  0xa8   :  { %s179_s15 = scalar_lea.hbm %s264_s2, 256 }
  0xa9   :  { %p180_p7 = scmp.ne.s32.totalorder %s264_s2, %s179_s15  ;;  %p183_p8 = scmp.lt.u32.totalorder %s179_s15, %s264_s2 }
  0xab   :  { %p185_p9 = pnand %p183_p8, %p180_p7 }
  0xad   :  { %188 = shalt.err (!%p185_p9)
}
  0xae   :  { %104 = dma.vmem_to_hbm [thread:$0]  %s99_s11, 256, %s264_s2, [#allocation4], %s199_s0, %s199_s0, %s200_s5  }
  0xaf   :  { %193 = dma.done.wait [#allocation4], 256  }
  0xb0   :  { %194 = vsyncadd [#allocation4], 4294967040 }
  0xb1   :  { %108 = vsyncpa [#allocation3], 1 }
  0xb2   :  { %109 = vsyncpa [#allocation6], 1 }
  0xb3   :  { %110 = vsyncpa [#allocation4], 1 }

</bundles_post_ra>
